<compile_context>
chip_gen: v6e
topology: v6e:2x2x1
jax: 0.10.0
libtpu: 0.0.40
codegen_flags: <defaults>
</compile_context>

<pallas_src>
import numpy as np
import jax
import jax.numpy as jnp
from jax.experimental import pallas as pl
from jax.experimental.pallas import tpu as pltpu


LANE_TILE = 1024   # lane-dense slab width (multiple of 128)


def _device_kind() -> str:
    try:
        return jax.devices()[0].device_kind.lower()
    except Exception:  # pragma: no cover - defensive only
        return ""


_KIND = _device_kind()
_IS_V7 = "v7" in _KIND
_IS_V5E = ("v5e" in _KIND) or ("v5 lite" in _KIND) or ("v5litepod" in _KIND)

# Rows per grid block (per generation):
#   v5e:     (512, 1024) f32 = 2 MiB block -> 8 MiB double-buffered  (<16 MiB scoped default)
#   v6e/v7x: (1024,1024) f32 = 4 MiB block -> 16 MiB double-buffered (<32 MiB scoped default)
ROW_TILE = 512 if _IS_V5E else 1024

# v7x has 2 TensorCores/chip: explicitly shard the row-block axis across them.
# v5e/v6e (1 TC): keep the plain "parallel" semantics.
_DIM_SEMANTICS = (pltpu.CORE_PARALLEL,) if _IS_V7 else ("parallel",)


def _scale_kernel(x_ref, scale_ref, o_ref):
    # Single load-mul-store body; the SMEM scalar read rides the scalar slot,
    # the multiply rides the VALU slot, stores are full-width vst (lane-dense).
    o_ref[...] = (x_ref[...] * scale_ref[0]).astype(o_ref.dtype)


@jax.jit
def _weight_scale_pallas(x2d, scale):
    """scale[0] * x2d for a lane-dense (rows, LANE_TILE) slab."""
    rows, lanes = x2d.shape
    # Full rows for small inputs (full-dim exemption from the multiple-of-8
    # rule), else ROW_TILE rows; a partial last block is masked by Pallas.
    block_rows = rows if rows < ROW_TILE else ROW_TILE
    grid = (pl.cdiv(rows, block_rows),)
    nbytes = x2d.size * x2d.dtype.itemsize

    return pl.pallas_call(
        _scale_kernel,
        out_shape=jax.ShapeDtypeStruct(x2d.shape, x2d.dtype),
        grid=grid,
        in_specs=[
            pl.BlockSpec((block_rows, lanes), lambda i: (i, 0)),
            pl.BlockSpec(memory_space=pltpu.MemorySpace.SMEM),  # (1,) scalar in SMEM
        ],
        out_specs=pl.BlockSpec((block_rows, lanes), lambda i: (i, 0)),
        compiler_params=pltpu.CompilerParams(
            dimension_semantics=_DIM_SEMANTICS),
        cost_estimate=pl.CostEstimate(
            flops=x2d.size, transcendentals=0, bytes_accessed=2 * nbytes),
    )(x2d, scale)


class WeightScaling:
    """JAX/Pallas port of Weight_Scaling: forward(x) = (gain / sqrt(fan_in)) * x."""

    # Below this element count a standalone memory-bound kernel launch is pure
    # overhead: fall back to a plain jnp multiply that XLA fuses into the
    # adjacent conv (no extra HBM read+write at all).
    _PALLAS_MIN_ELEMS = 1 << 18  # 256K elements (1 MiB f32)

    def __init__(self, fan_in: int, gain: float, min_pallas_elems: int | None = None):
        self.kaiming_const = float(gain / np.sqrt(fan_in))
        # Scalar operand (not a closure constant): one compiled kernel per
        # shape serves every WeightScaling instance in the Generator.
        self._scale = jnp.asarray([self.kaiming_const], dtype=jnp.float32)
        self._min = self._PALLAS_MIN_ELEMS if min_pallas_elems is None else int(min_pallas_elems)

    def _fallback(self, x: jax.Array) -> jax.Array:
        # Same math as the kernel (f32 multiply, cast back) so both paths
        # agree bit-for-bit on low-precision dtypes. XLA fuses this.
        return (x.astype(jnp.float32) * jnp.float32(self.kaiming_const)).astype(x.dtype)

    def __call__(self, x: jax.Array) -> jax.Array:
        total = x.size
        if total < self._min or total % LANE_TILE != 0:
            # Tiny or ragged tensor: no pad/slice copies, no kernel launch.
            return self._fallback(x)
        # Free (contiguous) reshape to a lane-dense 2D slab; no padding needed.
        x2d = x.reshape(total // LANE_TILE, LANE_TILE)
        return _weight_scale_pallas(x2d, self._scale).reshape(x.shape)


if __name__ == "__main__":
    key = jax.random.PRNGKey(0)
    k1, k2, k3 = jax.random.split(key, 3)

    # Module params as used inside _ModulatedConv: fan_in = C_in * k * k,
    # gain = LEAKY_RELU_GAIN = sqrt(2 / (1 + 0.2^2)).
    fan_in = 4 * 3 * 3
    gain = float(np.sqrt(2.0 / (1.0 + 0.2 ** 2)))
    module = WeightScaling(fan_in=fan_in, gain=gain, min_pallas_elems=0)  # force Pallas path

    # Primary example, NCHW like the Generator blocks see (aligned -> Pallas, grid=1).
    x = jax.random.normal(k1, (2, 4, 16, 16), dtype=jnp.float32)
    out = jax.block_until_ready(module(x))
    ref = jnp.float32(module.kaiming_const) * x
    np.testing.assert_allclose(np.asarray(out), np.asarray(ref), rtol=1e-6, atol=1e-6)

    # Larger input: exercises the multi-block pipelined grid (rows > ROW_TILE).
    x_big = jax.random.normal(k2, (8, 64, 64, 64), dtype=jnp.float32)
    out_big = jax.block_until_ready(module(x_big))
    ref_big = jnp.float32(module.kaiming_const) * x_big
    np.testing.assert_allclose(np.asarray(out_big), np.asarray(ref_big), rtol=1e-6, atol=1e-6)

    # Ragged size: takes the fused jnp fallback (no pad/slice round-trips).
    x_odd = jax.random.normal(k3, (3, 5, 7, 11), dtype=jnp.float32)
    out_odd = jax.block_until_ready(module(x_odd))
    ref_odd = jnp.float32(module.kaiming_const) * x_odd
    np.testing.assert_allclose(np.asarray(out_odd), np.asarray(ref_odd), rtol=1e-6, atol=1e-6)

    # Default-threshold module: small tensors take the fusion path.
    module_default = WeightScaling(fan_in=fan_in, gain=gain)
    out_small = jax.block_until_ready(module_default(x))
    np.testing.assert_allclose(np.asarray(out_small), np.asarray(ref), rtol=1e-6, atol=1e-6)

    print("KERNEL_OK")
</pallas_src>

<mosaic_0001>
module attributes {stable_mosaic.version = 11 : i64} {
  func.func @_scale_kernel(%arg0: i32, %arg1: memref<2x1024xf32, #tpu.memory_space<vmem>>, %arg2: memref<1xf32, #tpu.memory_space<smem>>, %arg3: memref<2x1024xf32, #tpu.memory_space<vmem>>) attributes {dimension_semantics = [#tpu.dimension_semantics<parallel>], iteration_bounds = array<i64: 1>, scalar_prefetch = 0 : i64, scratch_operands = 0 : i64, tpu.core_type = #tpu.core_type<tc>, window_params = [{transform_indices = @transform_0, window_bounds = array<i64: 2, 1024>}, {transform_indices = @transform_1, window_bounds = array<i64: 1>}, {transform_indices = @transform_2, window_bounds = array<i64: 2, 1024>}]} {
    %c0 = arith.constant 0 : index
    %c0_0 = arith.constant 0 : index
    %0 = vector.load %arg1[%c0, %c0_0] : memref<2x1024xf32, #tpu.memory_space<vmem>>, vector<2x1024xf32>
    %c0_1 = arith.constant 0 : index
    %1 = memref.load %arg2[%c0_1] : memref<1xf32, #tpu.memory_space<smem>>
    %2 = vector.broadcast %1 : f32 to vector<2x1024xf32>
    %3 = arith.mulf %0, %2 : vector<2x1024xf32>
    %c0_2 = arith.constant 0 : index
    %c0_3 = arith.constant 0 : index
    %4 = vector.load %arg3[%c0_2, %c0_3] : memref<2x1024xf32, #tpu.memory_space<vmem>>, vector<2x1024xf32>
    tpu.vector_store %arg3[%c0_2, %c0_3], %3 {strides = array<i32>} : memref<2x1024xf32, #tpu.memory_space<vmem>>, vector<2x1024xf32>,
    return
  }
  func.func @transform_0(%arg0: i32) -> (i32, i32) {
    %c0_i32 = arith.constant 0 : i32
    %c0_i32_0 = arith.constant 0 : i32
    return %arg0, %c0_i32 : i32, i32
  }
  func.func @transform_1(%arg0: i32) -> i32 {
    %c0_i32 = arith.constant 0 : i32
    %c0_i32_0 = arith.constant 0 : i32
    return %c0_i32 : i32
  }
  func.func @transform_2(%arg0: i32) -> (i32, i32) {
    %c0_i32 = arith.constant 0 : i32
    %c0_i32_0 = arith.constant 0 : i32
    return %arg0, %c0_i32 : i32, i32
  }
}

</mosaic_0001>

<bundles_post_ra>
// kernel: _weight_scale_pallas.1
= control target key start
LH: loop header
LB: loop body
LE: loop exit
PB: predicated region body
PF: predicated region fallthrough
CT: control target
= control target key end

     0   :  { %8 = vsyncpa [#allocation4], 0  ;;  %s120_s0 = inlined_call_operand.hbm [shape: f32[2,1024], index: 0, kind: input, shape index: {}]   ;;  %s121_s1 = inlined_call_operand.<no memory space> [shape: f32[1], index: 1, kind: input, shape index: {}]   ;;  %s122_s2 = inlined_call_operand.hbm [shape: f32[2,1024], index: 2, kind: output, shape index: {}]  }
   0x1   :  { %9 = vsyncpa [#allocation5], 0  ;;  %s94_s9 = smov [#allocation3]  }
   0x2   :  { %s16_s10 = sshll.u32 %s94_s9, 4  ;;  %s17_s10 = int_to_ptr.vmem [resolvable:$true] %s16_s10 }
   0x3   :  { %s58_s11 = scalar_lea.vmem %s17_s10, 256  ;;  %p63_p1 = scmp.lt.s32.totalorder %s17_s10, %s17_s10 }
   0x4   :  { %p59_p0 = scmp.ne.s32.totalorder %s17_s10, %s58_s11  ;;  %p64_p2 = scmp.lt.s32.totalorder %s58_s11, %s58_s11 }
   0x6   :  { %p65_p3 = por %p64_p2, %p63_p1 }
   0x8   :  { %p66_p4 = pnand %p65_p3, %p59_p0 }
   0xa   :  { %69 = shalt.err (!%p66_p4)
}
   0xb   :  { %19 = dma.hbm_to_vmem [thread:$0]  %s120_s0, 256, %s17_s10, [#allocation4]  }
   0xc   :  { %90 = dma.done.wait [#allocation4], 256  }
   0xd   :  { %91 = vsyncadd [#allocation4], 4294967040  ;;  %v28_v0 = vstv %s121_s1  ;;  %s95_s16 = smov [#allocation6]   ;;  %v25_v1 = vld [vmem:[#allocation3] sm:$0xff]  ;;  %v26_v2 = vld [vmem:[#allocation3 + $0x8] sm:$0xff] }
   0xe   :  { %s39_s17 = sshll.u32 %s95_s16, 4  ;;  %v29_v3 = vmul.f32 %v28_v0, %v25_v1  ;;  %v30_v4 = vmul.f32 %v28_v0, %v26_v2  ;;  %s40_s17 = int_to_ptr.vmem [resolvable:$true] %s39_s17 }
   0xf   :  { %s70_s18 = scalar_lea.vmem %s40_s17, 256  ;;  %p75_p6 = scmp.lt.s32.totalorder %s40_s17, %s40_s17 }
  0x10   :  { %31 = vst [vmem:[#allocation6] sm:$0xff] %v29_v3  ;;  %32 = vst [vmem:[#allocation6 + $0x8] sm:$0xff] %v30_v4  ;;  %p71_p5 = scmp.ne.s32.totalorder %s40_s17, %s70_s18  ;;  %p76_p7 = scmp.lt.s32.totalorder %s70_s18, %s70_s18 }
  0x12   :  { %p77_p8 = por %p76_p7, %p75_p6 }
  0x14   :  { %p78_p9 = pnand %p77_p8, %p71_p5 }
  0x16   :  { %81 = shalt.err (!%p78_p9)
}
  0x17   :  { %42 = dma.vmem_to_hbm [thread:$0]  %s40_s17, 256, %s122_s2, [#allocation5]  }
  0x18   :  { %92 = dma.done.wait [#allocation5], 256  }
  0x19   :  { %93 = vsyncadd [#allocation5], 4294967040 }
  0x1a   :  { %46 = vsyncpa [#allocation4], 1 }
  0x1b   :  { %47 = vsyncpa [#allocation5], 1 }

</bundles_post_ra>
